<compile_context>
chip_gen: v7x
topology: tpu7x:2x2x1
jax: 0.10.0
libtpu: 0.0.40
codegen_flags: <defaults>
</compile_context>

<pallas_src>
import functools
import math

import jax
import jax.numpy as jnp
from jax.experimental import pallas as pl
from jax.experimental.pallas import tpu as pltpu

_NEG_BIG = -1e30      # finite stand-in for -inf: keeps the online-softmax NaN-free
_LANE = 128
_SUBLANE = 8


def _round_up(x, m):
    return ((x + m - 1) // m) * m


def _flash_attn_kernel(q_ref, k_ref, v_ref, mask_ref, o_ref,
                       q_sc, m_sc, l_sc, acc_sc, *, scale):
    # q_ref: (TQ, Dp)  k_ref: (TK, Dp)  v_ref: (TK, Dvp)  mask_ref: (TQ, TK)
    # o_ref: (TQ, Dvp)
    # scratch: q_sc (TQ, Dp) compute dtype; m_sc/l_sc (TQ, 1) f32; acc_sc (TQ, Dvp) f32
    ki = pl.program_id(2)

    @pl.when(ki == 0)
    def _init():
        # q block is resident across the whole KV axis: scale it once per query
        # tile instead of every KV step.
        q_sc[...] = q_ref[...] * scale
        m_sc[...] = jnp.full_like(m_sc, _NEG_BIG)
        l_sc[...] = jnp.zeros_like(l_sc)
        acc_sc[...] = jnp.zeros_like(acc_sc)

    # QK^T: contract feature dims of both operands (transposed-RHS matmul maps
    # directly to the MXU; no materialized transpose).  Operands stay in the
    # (typically bf16) streaming dtype; scores accumulate in f32.
    s = jax.lax.dot_general(
        q_sc[...], k_ref[...],
        dimension_numbers=(((1,), (1,)), ((), ())),
        preferred_element_type=jnp.float32)
    s = s + mask_ref[...].astype(jnp.float32)

    # Online (flash) softmax update.
    m_prev = m_sc[...]
    m_new = jnp.maximum(m_prev, jnp.max(s, axis=-1, keepdims=True))
    alpha = jnp.exp(m_prev - m_new)
    p = jnp.exp(s - m_new)

    l_sc[...] = alpha * l_sc[...] + jnp.sum(p, axis=-1, keepdims=True)
    acc_sc[...] = alpha * acc_sc[...] + jax.lax.dot_general(
        p.astype(v_ref.dtype), v_ref[...],
        dimension_numbers=(((1,), (0,)), ((), ())),
        preferred_element_type=jnp.float32)
    m_sc[...] = m_new

    @pl.when(ki == pl.num_programs(2) - 1)
    def _finalize():
        # One divide per query tile; approx reciprocal runs on the EUP slot.
        inv_l = pl.reciprocal(l_sc[...], approx=True)
        o_ref[...] = (acc_sc[...] * inv_l).astype(o_ref.dtype)


def _maybe_pad(x, pad_widths, value=0.0):
    """jnp.pad, skipped entirely when no padding is required."""
    if all(lo == 0 and hi == 0 for lo, hi in pad_widths):
        return x
    return jnp.pad(x, pad_widths, constant_values=value)


def attention(q, k, v, attn_mask, *, tq=256, tk=512,
              compute_dtype=jnp.bfloat16, kv_buffer_count=2):
    """softmax(q @ k^T / sqrt(D) + attn_mask, -1) @ v.

    q, k: (B, S, D); v: (B, Sk, Dv); attn_mask: (B, Sq, Sk) additive mask.
    compute_dtype: dtype used for the HBM streams and MXU operands (f32
      accumulation regardless).  Pass jnp.float32 for bit-closer results.
    kv_buffer_count: >2 enables deeper pipelining of the k/v/mask streams
      (useful on v5e where HBM bandwidth is lowest).
    """
    B, Sq, D = q.shape
    _, Sk, _ = k.shape
    _, _, Dv = v.shape
    assert attn_mask.shape == (B, Sq, Sk)
    out_dtype = q.dtype

    # Lane-dense feature dims; sublane-/lane-aligned sequence tiles.
    Dp = _round_up(D, _LANE)
    Dvp = _round_up(Dv, _LANE)

    TQ = min(tq, _round_up(Sq, _SUBLANE))
    # Dual-TC (v7x) / megacore: keep at least 2 "parallel" (b, qi) tiles when
    # the problem size allows it.
    while TQ > _SUBLANE and B * pl.cdiv(Sq, TQ) < 2:
        TQ = _round_up(TQ // 2, _SUBLANE)
    TK = min(tk, _round_up(Sk, _LANE))
    Sqp = _round_up(Sq, TQ)
    Skp = _round_up(Sk, TK)

    # Stream everything in the narrow compute dtype (halves HBM traffic for f32
    # inputs).  Zero-pad features (doesn't change dot products); padded key
    # positions get a large negative additive mask so they take zero weight;
    # padded query rows are sliced off after the call (their mask columns are
    # padded with 0 — harmless, those rows are discarded).
    qp = _maybe_pad(q.astype(compute_dtype), ((0, 0), (0, Sqp - Sq), (0, Dp - D)))
    kp = _maybe_pad(k.astype(compute_dtype), ((0, 0), (0, Skp - Sk), (0, Dp - D)))
    vp = _maybe_pad(v.astype(compute_dtype), ((0, 0), (0, Skp - Sk), (0, Dvp - Dv)))
    mp = _maybe_pad(attn_mask.astype(compute_dtype),
                    ((0, 0), (0, 0), (0, Skp - Sk)), value=_NEG_BIG)
    mp = _maybe_pad(mp, ((0, 0), (0, Sqp - Sq), (0, 0)))

    def _kv_spec(block_shape, index_map):
        if kv_buffer_count > 2:
            return pl.BlockSpec(block_shape, index_map,
                                pipeline_mode=pl.Buffered(kv_buffer_count))
        return pl.BlockSpec(block_shape, index_map)

    grid = (B, Sqp // TQ, Skp // TK)
    scale = 1.0 / math.sqrt(D)   # scale uses the *original* feature dim
    kernel = functools.partial(_flash_attn_kernel, scale=scale)

    out = pl.pallas_call(
        kernel,
        out_shape=jax.ShapeDtypeStruct((B, Sqp, Dvp), out_dtype),
        grid_spec=pltpu.PrefetchScalarGridSpec(
            num_scalar_prefetch=0,
            grid=grid,
            in_specs=[
                pl.BlockSpec((pl.Squeezed(), TQ, Dp), lambda b, qi, ki: (b, qi, 0)),
                _kv_spec((pl.Squeezed(), TK, Dp), lambda b, qi, ki: (b, ki, 0)),
                _kv_spec((pl.Squeezed(), TK, Dvp), lambda b, qi, ki: (b, ki, 0)),
                _kv_spec((pl.Squeezed(), TQ, TK), lambda b, qi, ki: (b, qi, ki)),
            ],
            out_specs=pl.BlockSpec((pl.Squeezed(), TQ, Dvp),
                                   lambda b, qi, ki: (b, qi, 0)),
            scratch_shapes=[
                pltpu.VMEM((TQ, Dp), compute_dtype),  # pre-scaled q
                pltpu.VMEM((TQ, 1), jnp.float32),     # running max
                pltpu.VMEM((TQ, 1), jnp.float32),     # running denom
                pltpu.VMEM((TQ, Dvp), jnp.float32),   # output accumulator
            ],
        ),
        compiler_params=pltpu.CompilerParams(
            dimension_semantics=("parallel", "parallel", "arbitrary"),
            vmem_limit_bytes=32 * 1024 * 1024,
        ),
    )(qp, kp, vp, mp)

    return out[:, :Sq, :Dv]


def _reference(q, k, v, attn_mask):
    s = jnp.einsum("bqd,bkd->bqk", q, k) / math.sqrt(q.shape[-1])
    s = s + attn_mask
    w = jax.nn.softmax(s, axis=-1)
    return jnp.einsum("bqk,bkd->bqd", w, v)


if __name__ == "__main__":
    key = jax.random.PRNGKey(0)
    kq, kk, kv_, km = jax.random.split(key, 4)

    # Shapes from the PyTorch module: q,k (1,4,8), v (1,4,4), mask (1,4,4).
    B, Sq, Sk, D, Dv = 1, 4, 4, 8, 4
    q = jax.random.normal(kq, (B, Sq, D), dtype=jnp.float32)
    k = jax.random.normal(kk, (B, Sk, D), dtype=jnp.float32)
    v = jax.random.normal(kv_, (B, Sk, Dv), dtype=jnp.float32)
    # attn_mask is a free global in the original snippet; initialize it here.
    attn_mask = jax.random.normal(km, (B, Sq, Sk), dtype=jnp.float32)

    ref = _reference(q, k, v, attn_mask)

    # Default fast path: bf16 streaming / MXU operands, f32 accumulation.
    out = attention(q, k, v, attn_mask)
    jax.block_until_ready(out)
    assert out.shape == (B, Sq, Dv)
    assert jnp.allclose(out, ref, atol=3e-2, rtol=3e-2), "bf16 path mismatch vs reference"

    # Full-precision path (f32 streams / MXU), tighter tolerance.
    out32 = attention(q, k, v, attn_mask, compute_dtype=jnp.float32)
    jax.block_until_ready(out32)
    assert jnp.allclose(out32, ref, atol=5e-3, rtol=5e-3), "f32 path mismatch vs reference"

    print("KERNEL_OK")
</pallas_src>

<mosaic_0001>
module attributes {stable_mosaic.version = 11 : i64} {
  func.func @_flash_attn_kernel(%arg0: i32, %arg1: i32, %arg2: i32, %arg3: memref<1x8x128xbf16, #tpu.memory_space<vmem>>, %arg4: memref<1x128x128xbf16, #tpu.memory_space<vmem>>, %arg5: memref<1x128x128xbf16, #tpu.memory_space<vmem>>, %arg6: memref<1x8x128xbf16, #tpu.memory_space<vmem>>, %arg7: memref<1x8x128xf32, #tpu.memory_space<vmem>>, %arg8: memref<8x128xbf16, #tpu.memory_space<vmem>>, %arg9: memref<8x1xf32, #tpu.memory_space<vmem>>, %arg10: memref<8x1xf32, #tpu.memory_space<vmem>>, %arg11: memref<8x128xf32, #tpu.memory_space<vmem>>) attributes {dimension_semantics = [#tpu.dimension_semantics<parallel>, #tpu.dimension_semantics<parallel>, #tpu.dimension_semantics<arbitrary>], iteration_bounds = array<i64: 1, 1, 1>, scalar_prefetch = 0 : i64, scratch_operands = 4 : i64, tpu.core_type = #tpu.core_type<tc>, window_params = [{transform_indices = @transform_0, window_bounds = array<i64: 1, 8, 128>}, {transform_indices = @transform_1, window_bounds = array<i64: 1, 128, 128>}, {transform_indices = @transform_2, window_bounds = array<i64: 1, 128, 128>}, {transform_indices = @transform_3, window_bounds = array<i64: 1, 8, 128>}, {transform_indices = @transform_4, window_bounds = array<i64: 1, 8, 128>}]} {
    %c0_i32 = arith.constant 0 : i32
    %0 = arith.cmpi eq, %arg2, %c0_i32 : i32
    %1 = arith.extui %0 : i1 to i32
    %c0_i32_0 = arith.constant 0 : i32
    %2 = arith.cmpi ne, %1, %c0_i32_0 : i32
    scf.if %2 {
      %c0_28 = arith.constant 0 : index
      %c0_29 = arith.constant 0 : index
      %c0_30 = arith.constant 0 : index
      %39 = vector.load %arg3[%c0_28, %c0_29, %c0_30] : memref<1x8x128xbf16, #tpu.memory_space<vmem>>, vector<1x8x128xbf16>
      %40 = vector.shape_cast %39 : vector<1x8x128xbf16> to vector<8x128xbf16>
      %cst_31 = arith.constant 3.535160e-01 : bf16
      %41 = vector.broadcast %cst_31 : bf16 to vector<8x128xbf16>
      %42 = arith.mulf %40, %41 : vector<8x128xbf16>
      %c0_32 = arith.constant 0 : index
      %c0_33 = arith.constant 0 : index
      %43 = vector.load %arg8[%c0_32, %c0_33] : memref<8x128xbf16, #tpu.memory_space<vmem>>, vector<8x128xbf16>
      tpu.vector_store %arg8[%c0_32, %c0_33], %42 {strides = array<i32>} : memref<8x128xbf16, #tpu.memory_space<vmem>>, vector<8x128xbf16>,
      %cst_34 = arith.constant -1.000000e+30 : f32
      %44 = vector.broadcast %cst_34 : f32 to vector<8x1xf32>
      %c0_35 = arith.constant 0 : index
      %c0_36 = arith.constant 0 : index
      %45 = vector.load %arg9[%c0_35, %c0_36] : memref<8x1xf32, #tpu.memory_space<vmem>>, vector<8x1xf32>
      tpu.vector_store %arg9[%c0_35, %c0_36], %44 {strides = array<i32>} : memref<8x1xf32, #tpu.memory_space<vmem>>, vector<8x1xf32>,
      %cst_37 = arith.constant 0.000000e+00 : f32
      %46 = vector.broadcast %cst_37 : f32 to vector<8x1xf32>
      %c0_38 = arith.constant 0 : index
      %c0_39 = arith.constant 0 : index
      %47 = vector.load %arg10[%c0_38, %c0_39] : memref<8x1xf32, #tpu.memory_space<vmem>>, vector<8x1xf32>
      tpu.vector_store %arg10[%c0_38, %c0_39], %46 {strides = array<i32>} : memref<8x1xf32, #tpu.memory_space<vmem>>, vector<8x1xf32>,
      %cst_40 = arith.constant 0.000000e+00 : f32
      %48 = vector.broadcast %cst_40 : f32 to vector<8x128xf32>
      %c0_41 = arith.constant 0 : index
      %c0_42 = arith.constant 0 : index
      %49 = vector.load %arg11[%c0_41, %c0_42] : memref<8x128xf32, #tpu.memory_space<vmem>>, vector<8x128xf32>
      tpu.vector_store %arg11[%c0_41, %c0_42], %48 {strides = array<i32>} : memref<8x128xf32, #tpu.memory_space<vmem>>, vector<8x128xf32>,
    } else {
    }
    %c0 = arith.constant 0 : index
    %c0_1 = arith.constant 0 : index
    %3 = vector.load %arg8[%c0, %c0_1] : memref<8x128xbf16, #tpu.memory_space<vmem>>, vector<8x128xbf16>
    %c0_2 = arith.constant 0 : index
    %c0_3 = arith.constant 0 : index
    %c0_4 = arith.constant 0 : index
    %4 = vector.load %arg4[%c0_2, %c0_3, %c0_4] : memref<1x128x128xbf16, #tpu.memory_space<vmem>>, vector<1x128x128xbf16>
    %5 = vector.shape_cast %4 : vector<1x128x128xbf16> to vector<128x128xbf16>
    %cst = arith.constant dense<0.000000e+00> : vector<8x128xf32>
    %6 = tpu.matmul %3, %5, %cst {dimension_numbers = #tpu.dot_dimension_numbers<[1], [1], [0], [0], [0, 0, 1, 0], [], []>} : vector<8x128xbf16>, vector<128x128xbf16>, vector<8x128xf32> -> vector<8x128xf32>
    %c0_5 = arith.constant 0 : index
    %c0_6 = arith.constant 0 : index
    %c0_7 = arith.constant 0 : index
    %7 = vector.load %arg6[%c0_5, %c0_6, %c0_7] : memref<1x8x128xbf16, #tpu.memory_space<vmem>>, vector<1x8x128xbf16>
    %8 = vector.shape_cast %7 : vector<1x8x128xbf16> to vector<8x128xbf16>
    %9 = arith.extf %8 : vector<8x128xbf16> to vector<8x128xf32>
    %10 = arith.addf %6, %9 : vector<8x128xf32>
    %c0_8 = arith.constant 0 : index
    %c0_9 = arith.constant 0 : index
    %11 = vector.load %arg9[%c0_8, %c0_9] : memref<8x1xf32, #tpu.memory_space<vmem>>, vector<8x1xf32>
    %cst_10 = arith.constant dense<0xFF800000> : vector<8xf32>
    %12 = vector.multi_reduction <maximumf>, %10, %cst_10 [1] : vector<8x128xf32> to vector<8xf32>
    %13 = vector.shape_cast %12 : vector<8xf32> to vector<8x1xf32>
    %14 = arith.maximumf %11, %13 : vector<8x1xf32>
    %15 = arith.subf %11, %14 : vector<8x1xf32>
    %16 = math.exp %15 : vector<8x1xf32>
    %17 = vector.broadcast %14 : vector<8x1xf32> to vector<8x128xf32>
    %18 = arith.subf %10, %17 : vector<8x128xf32>
    %19 = math.exp %18 : vector<8x128xf32>
    %c0_11 = arith.constant 0 : index
    %c0_12 = arith.constant 0 : index
    %20 = vector.load %arg10[%c0_11, %c0_12] : memref<8x1xf32, #tpu.memory_space<vmem>>, vector<8x1xf32>
    %21 = arith.mulf %16, %20 : vector<8x1xf32>
    %cst_13 = arith.constant dense<0.000000e+00> : vector<8xf32>
    %22 = vector.multi_reduction <add>, %19, %cst_13 [1] : vector<8x128xf32> to vector<8xf32>
    %23 = vector.shape_cast %22 : vector<8xf32> to vector<8x1xf32>
    %24 = arith.addf %21, %23 : vector<8x1xf32>
    %c0_14 = arith.constant 0 : index
    %c0_15 = arith.constant 0 : index
    %25 = vector.load %arg10[%c0_14, %c0_15] : memref<8x1xf32, #tpu.memory_space<vmem>>, vector<8x1xf32>
    tpu.vector_store %arg10[%c0_14, %c0_15], %24 {strides = array<i32>} : memref<8x1xf32, #tpu.memory_space<vmem>>, vector<8x1xf32>,
    %c0_16 = arith.constant 0 : index
    %c0_17 = arith.constant 0 : index
    %26 = vector.load %arg11[%c0_16, %c0_17] : memref<8x128xf32, #tpu.memory_space<vmem>>, vector<8x128xf32>
    %27 = vector.broadcast %16 : vector<8x1xf32> to vector<8x128xf32>
    %28 = arith.mulf %27, %26 : vector<8x128xf32>
    %29 = arith.truncf %19 : vector<8x128xf32> to vector<8x128xbf16>
    %c0_18 = arith.constant 0 : index
    %c0_19 = arith.constant 0 : index
    %c0_20 = arith.constant 0 : index
    %30 = vector.load %arg5[%c0_18, %c0_19, %c0_20] : memref<1x128x128xbf16, #tpu.memory_space<vmem>>, vector<1x128x128xbf16>
    %31 = vector.shape_cast %30 : vector<1x128x128xbf16> to vector<128x128xbf16>
    %cst_21 = arith.constant dense<0.000000e+00> : vector<8x128xf32>
    %32 = tpu.matmul %29, %31, %cst_21 {dimension_numbers = #tpu.dot_dimension_numbers<[1], [0], [0], [1], [0, 0, 1, 1], [], []>} : vector<8x128xbf16>, vector<128x128xbf16>, vector<8x128xf32> -> vector<8x128xf32>
    %33 = arith.addf %28, %32 : vector<8x128xf32>
    %c0_22 = arith.constant 0 : index
    %c0_23 = arith.constant 0 : index
    %34 = vector.load %arg11[%c0_22, %c0_23] : memref<8x128xf32, #tpu.memory_space<vmem>>, vector<8x128xf32>
    tpu.vector_store %arg11[%c0_22, %c0_23], %33 {strides = array<i32>} : memref<8x128xf32, #tpu.memory_space<vmem>>, vector<8x128xf32>,
    %c0_24 = arith.constant 0 : index
    %c0_25 = arith.constant 0 : index
    %35 = vector.load %arg9[%c0_24, %c0_25] : memref<8x1xf32, #tpu.memory_space<vmem>>, vector<8x1xf32>
    tpu.vector_store %arg9[%c0_24, %c0_25], %14 {strides = array<i32>} : memref<8x1xf32, #tpu.memory_space<vmem>>, vector<8x1xf32>,
    %c0_i32_26 = arith.constant 0 : i32
    %36 = arith.cmpi eq, %arg2, %c0_i32_26 : i32
    %37 = arith.extui %36 : i1 to i32
    %c0_i32_27 = arith.constant 0 : i32
    %38 = arith.cmpi ne, %37, %c0_i32_27 : i32
    scf.if %38 {
      %c0_28 = arith.constant 0 : index
      %c0_29 = arith.constant 0 : index
      %39 = vector.load %arg10[%c0_28, %c0_29] : memref<8x1xf32, #tpu.memory_space<vmem>>, vector<8x1xf32>
      %40 = tpu.reciprocal %39 {approx = true} : vector<8x1xf32> -> vector<8x1xf32>
      %c0_30 = arith.constant 0 : index
      %c0_31 = arith.constant 0 : index
      %41 = vector.load %arg11[%c0_30, %c0_31] : memref<8x128xf32, #tpu.memory_space<vmem>>, vector<8x128xf32>
      %42 = vector.broadcast %40 : vector<8x1xf32> to vector<8x128xf32>
      %43 = arith.mulf %41, %42 : vector<8x128xf32>
      %c0_32 = arith.constant 0 : index
      %c0_33 = arith.constant 0 : index
      %c0_34 = arith.constant 0 : index
      %44 = vector.load %arg7[%c0_32, %c0_33, %c0_34] : memref<1x8x128xf32, #tpu.memory_space<vmem>>, vector<1x8x128xf32>
      %45 = vector.shape_cast %44 : vector<1x8x128xf32> to vector<8x128xf32>
      %46 = vector.shape_cast %43 : vector<8x128xf32> to vector<1x8x128xf32>
      tpu.vector_store %arg7[%c0_32, %c0_33, %c0_34], %46 {strides = array<i32>} : memref<1x8x128xf32, #tpu.memory_space<vmem>>, vector<1x8x128xf32>,
    } else {
    }
    return
  }
  func.func @transform_0(%arg0: i32, %arg1: i32, %arg2: i32) -> (i32, i32, i32) {
    %c0_i32 = arith.constant 0 : i32
    %c0_i32_0 = arith.constant 0 : i32
    return %arg0, %arg1, %c0_i32 : i32, i32, i32
  }
  func.func @transform_1(%arg0: i32, %arg1: i32, %arg2: i32) -> (i32, i32, i32) {
    %c0_i32 = arith.constant 0 : i32
    %c0_i32_0 = arith.constant 0 : i32
    return %arg0, %arg2, %c0_i32 : i32, i32, i32
  }
  func.func @transform_2(%arg0: i32, %arg1: i32, %arg2: i32) -> (i32, i32, i32) {
    %c0_i32 = arith.constant 0 : i32
    %c0_i32_0 = arith.constant 0 : i32
    return %arg0, %arg2, %c0_i32 : i32, i32, i32
  }
  func.func @transform_3(%arg0: i32, %arg1: i32, %arg2: i32) -> (i32, i32, i32) {
    %c0_i32 = arith.constant 0 : i32
    return %arg0, %arg1, %arg2 : i32, i32, i32
  }
  func.func @transform_4(%arg0: i32, %arg1: i32, %arg2: i32) -> (i32, i32, i32) {
    %c0_i32 = arith.constant 0 : i32
    %c0_i32_0 = arith.constant 0 : i32
    return %arg0, %arg1, %c0_i32 : i32, i32, i32
  }
}

</mosaic_0001>

<bundles_post_ra>
// kernel: tpu_custom_call.1
= control target key start
LH: loop header
LB: loop body
LE: loop exit
PB: predicated region body
PF: predicated region fallthrough
CT: control target
= control target key end

     0   :  { %9 = vsyncpa [#allocation7], 0  ;;  %s660_s0 = inlined_call_operand.hbm [shape: bf16[1,8,128], index: 0, kind: input, shape index: {}]   ;;  %s661_s1 = inlined_call_operand.hbm [shape: bf16[1,128,128], index: 1, kind: input, shape index: {}]   ;;  %s662_s2 = inlined_call_operand.hbm [shape: bf16[1,128,128], index: 2, kind: input, shape index: {}]   ;;  %s663_s3 = inlined_call_operand.vmem [shape: bf16[1,8,128], index: 3, kind: input, shape index: {}]   ;;  %s664_s4 = inlined_call_operand.hbm [shape: f32[1,8,128], index: 4, kind: output, shape index: {}]  }
   0x1   :  { %10 = vsyncpa [#allocation10], 0 }
   0x2   :  { %11 = vsyncpa [#allocation8], 0  ;;  %s545_s15 = smov [#allocation9]   ;;  %s451_s19 = scalar_lea.hbm %s661_s1, 1024 }
   0x3   :  { %s27_s16 = sshll.u32 %s545_s15, 4  ;;  %p452_p0 = scmp.ne.s32.totalorder %s661_s1, %s451_s19  ;;  %s28_s16 = int_to_ptr.vmem [resolvable:$true] %s27_s16 }
   0x4   :  { %p455_p1 = scmp.lt.u32.totalorder %s451_s19, %s661_s1 }
   0x6   :  { %p457_p2 = pnand %p455_p1, %p452_p0 }
   0x8   :  { %460 = shalt.err (!%p457_p2)
}
   0x9   :  { %s461_s24 = scalar_lea.vmem %s28_s16, 1024  ;;  %p466_p4 = scmp.lt.s32.totalorder %s28_s16, %s28_s16 }
   0xa   :  { %p462_p3 = scmp.ne.s32.totalorder %s28_s16, %s461_s24  ;;  %p467_p5 = scmp.lt.s32.totalorder %s461_s24, %s461_s24 }
   0xc   :  { %p468_p6 = por %p467_p5, %p466_p4 }
   0xe   :  { %p469_p7 = pnand %p468_p6, %p462_p3 }
  0x10   :  { %472 = shalt.err (!%p469_p7)
}
  0x11   :  { %s546_s25 = smov 64   ;;  %s547_s26 = smov 4  }
  0x12   :  { %33 = dma.hbm_to_vmem [thread:$0]  %s661_s1, 1024, %s28_s16, [#allocation10], %s546_s25, %s546_s25, %s547_s26  }
  0x13   :  { %s548_s29 = smov [#allocation6]   ;;  %s549_s5 = smov [#allocation11]  }
  0x14   :  { %s18_s30 = sshll.u32 %s548_s29, 4  ;;  %s39_s6 = sshll.u32 %s549_s5, 4  ;;  %s19_s30 = int_to_ptr.vmem [resolvable:$true] %s18_s30  ;;  %s40_s6 = int_to_ptr.vmem [resolvable:$true] %s39_s6 }
  0x15   :  { %s473_s9 = scalar_lea.hbm %s660_s0, 64 }
  0x16   :  { %p474_p8 = scmp.ne.s32.totalorder %s660_s0, %s473_s9  ;;  %p477_p9 = scmp.lt.u32.totalorder %s473_s9, %s660_s0 }
  0x18   :  { %p479_p10 = pnand %p477_p9, %p474_p8 }
  0x1a   :  { %482 = shalt.err (!%p479_p10)
}
  0x1b   :  { %s483_s1 = scalar_lea.vmem %s19_s30, 64  ;;  %p488_p12 = scmp.lt.s32.totalorder %s19_s30, %s19_s30 }
  0x1c   :  { %p484_p11 = scmp.ne.s32.totalorder %s19_s30, %s483_s1  ;;  %p489_p13 = scmp.lt.s32.totalorder %s483_s1, %s483_s1 }
  0x1e   :  { %p490_p0 = por %p489_p13, %p488_p12 }
  0x20   :  { %p491_p1 = pnand %p490_p0, %p484_p11 }
  0x22   :  { %494 = shalt.err (!%p491_p1)
}
  0x23   :  { %21 = dma.hbm_to_vmem [thread:$0]  %s660_s0, 64, %s19_s30, [#allocation7]  }
  0x24   :  { %s495_s18 = scalar_lea.hbm %s662_s2, 1024 }
  0x25   :  { %p496_p2 = scmp.ne.s32.totalorder %s662_s2, %s495_s18  ;;  %p499_p3 = scmp.lt.u32.totalorder %s495_s18, %s662_s2 }
  0x27   :  { %p501_p4 = pnand %p499_p3, %p496_p2 }
  0x29   :  { %504 = shalt.err (!%p501_p4)
}
  0x2a   :  { %s505_s23 = scalar_lea.vmem %s40_s6, 1024  ;;  %p510_p6 = scmp.lt.s32.totalorder %s40_s6, %s40_s6 }
  0x2b   :  { %p506_p5 = scmp.ne.s32.totalorder %s40_s6, %s505_s23  ;;  %p511_p7 = scmp.lt.s32.totalorder %s505_s23, %s505_s23 }
  0x2d   :  { %p512_p8 = por %p511_p7, %p510_p6 }
  0x2f   :  { %p513_p9 = pnand %p512_p8, %p506_p5 }
  0x31   :  { %516 = shalt.err (!%p513_p9)
}
  0x32   :  { %45 = dma.hbm_to_vmem [thread:$0]  %s662_s2, 1024, %s40_s6, [#allocation10], %s546_s25, %s546_s25, %s547_s26  }
  0x33   :  { %539 = dma.done.wait [#allocation7], 64  }
  0x34   :  { %540 = vsyncadd [#allocation7], 4294967232 }
  0x35   :  { %541 = dma.done.wait [#allocation10], 2048  }
  0x36   :  { %542 = vsyncadd [#allocation10], 4294965248  ;;  %v550_v0 = vmov 0.0   ;;  %vm551_vm0 = vmmov 0   ;;  %v429_v1 = vld [vmem:[#allocation9] sm:$0xff]   ;;  %v430_v2 = vld [vmem:[#allocation9 + $0x8] sm:$0xff]  }
  0x37   :  { %377 = vmatprep.subr.bf16.mxu0 %v550_v0  ;;  %393 = vmatprep.mubr.msk.bf16.mxu0 %vm551_vm0, %v550_v0  ;;  %v63_v3 = vld [vmem:[#allocation6] sm:$0xf]  ;;  %v431_v5 = vld [vmem:[#allocation9 + $0x10] sm:$0xff]   ;;  %v433_v7 = vld [vmem:[#allocation9 + $0x20] sm:$0xff]   ;;  %vm66_vm1 = vcmask 7168   ;;  %v553_v20 = vmov 0  }
  0x38   :  { %397 = vmatprep.subr.bf16.mxu1 %v550_v0  ;;  %413 = vmatprep.mubr.msk.bf16.mxu1 %vm551_vm0, %v550_v0  ;;  %v64_v4 = vmul.bf16 1052065461, %v63_v3  ;;  %v432_v6 = vld [vmem:[#allocation9 + $0x18] sm:$0xff]   ;;  %v434_v8 = vld [vmem:[#allocation9 + $0x28] sm:$0xff]   ;;  %v435_v9 = vld [vmem:[#allocation9 + $0x30] sm:$0xff]   ;;  %68 = vst.msk [vmem:[#allocation4] sm:$0xff] %vm66_vm1, %v550_v0 }
  0x39   :  { %378 = vmatpush3.bf16.xpose.msra.mxu0 %v429_v1  ;;  %v436_v10 = vld [vmem:[#allocation9 + $0x38] sm:$0xff]   ;;  %v552_v12 = vmov -1e+30   ;;  %v87_v13 = vld [vmem:[%s663_s3] sm:$0xf]  ;;  %427 = vset.pattern.permute.xlu0 %v553_v20  ;;  %v437_v21 = vld [vmem:[#allocation11] sm:$0xff]  }
  0x3a   :  { %379 = vmatprep.subr.bf16.mxu0 %v550_v0  ;;  %65 = vst [vmem:[#allocation2] sm:$0xf] %v64_v4  ;;  %67 = vst.msk [vmem:[#allocation3] sm:$0xff] %vm66_vm1, %v552_v12  ;;  %v88_v14 = vunpack.c.l.bf16 %v87_v13  ;;  %428 = vset.pattern.permute.xlu1 %v553_v20  ;;  %v438_v22 = vld [vmem:[#allocation11 + $0x8] sm:$0xff]   ;;  %v439_v23 = vld [vmem:[#allocation11 + $0x10] sm:$0xff]   ;;  %s554_s3 = smov [#allocation12]  }
  0x3b   :  { %398 = vmatpush3.bf16.msra.mxu1 %v437_v21  ;;  %v440_v24 = vld [vmem:[#allocation11 + $0x18] sm:$0xff]   ;;  %v441_v29 = vld [vmem:[#allocation11 + $0x20] sm:$0xff]   ;;  %v442_v30 = vld [vmem:[#allocation11 + $0x28] sm:$0xff]   ;;  %s333_s26 = sshll.u32 %s554_s3, 4  ;;  %s334_s26 = int_to_ptr.vmem [resolvable:$true] %s333_s26 }
  0x3c   :  { %399 = vmatprep.subr.bf16.mxu1 %v550_v0  ;;  %v443_v31 = vld [vmem:[#allocation11 + $0x30] sm:$0xff]   ;;  %v444_v32 = vld [vmem:[#allocation11 + $0x38] sm:$0xff]   ;;  %s517_s27 = scalar_lea.vmem %s334_s26, 128  ;;  %p522_p11 = scmp.lt.s32.totalorder %s334_s26, %s334_s26 }
  0x3d   :  { %p518_p10 = scmp.ne.s32.totalorder %s334_s26, %s517_s27  ;;  %p523_p12 = scmp.lt.s32.totalorder %s517_s27, %s517_s27 }
  0x3f   :  { %400 = vmatpush3.bf16.msra.mxu1 %v438_v22  ;;  %v192_v40 = vld [vmem:[#allocation4] sm:$0xff]  ;;  %p524_p13 = por %p523_p12, %p522_p11 }
  0x40   :  { %401 = vmatprep.subr.bf16.mxu1 %v550_v0 }
  0x41   :  { %380 = vmatpush3.bf16.xpose.msra.mxu0 %v430_v2  ;;  %v70_v11 = vld [vmem:[#allocation2] sm:$0xf]  ;;  %v177_v25 = vld [vmem:[#allocation3] sm:$0xff]  ;;  %p525_p0 = pnand %p524_p13, %p518_p10 }
  0x42   :  { %381 = vmatprep.subr.bf16.mxu0 %v550_v0 }
  0x43   :  { %402 = vmatpush3.bf16.msra.mxu1 %v439_v23 }
  0x44   :  { %403 = vmatprep.subr.bf16.mxu1 %v550_v0 }
  0x47   :  { %404 = vmatpush3.bf16.msra.mxu1 %v440_v24 }
  0x48   :  { %405 = vmatprep.subr.bf16.mxu1 %v550_v0 }
  0x49   :  { %382 = vmatpush3.bf16.xpose.msra.mxu0 %v431_v5 }
  0x4a   :  { %383 = vmatprep.subr.bf16.mxu0 %v550_v0 }
  0x4b   :  { %406 = vmatpush3.bf16.msra.mxu1 %v441_v29 }
  0x4c   :  { %407 = vmatprep.subr.bf16.mxu1 %v550_v0 }
  0x4f   :  { %408 = vmatpush3.bf16.msra.mxu1 %v442_v30 }
  0x50   :  { %409 = vmatprep.subr.bf16.mxu1 %v550_v0 }
  0x51   :  { %384 = vmatpush3.bf16.xpose.msra.mxu0 %v432_v6 }
  0x52   :  { %385 = vmatprep.subr.bf16.mxu0 %v550_v0 }
  0x53   :  { %410 = vmatpush3.bf16.msra.mxu1 %v443_v31 }
  0x54   :  { %411 = vmatprep.subr.bf16.mxu1 %v550_v0 }
  0x57   :  { %412 = vmatpush3.bf16.msra.mxu1 %v444_v32 }
  0x59   :  { %386 = vmatpush3.bf16.xpose.msra.mxu0 %v433_v7 }
  0x5a   :  { %387 = vmatprep.subr.bf16.mxu0 %v550_v0 }
  0x61   :  { %388 = vmatpush3.bf16.xpose.msra.mxu0 %v434_v8 }
  0x62   :  { %389 = vmatprep.subr.bf16.mxu0 %v550_v0 }
  0x69   :  { %390 = vmatpush3.bf16.xpose.msra.mxu0 %v435_v9 }
  0x6a   :  { %391 = vmatprep.subr.bf16.mxu0 %v550_v0 }
  0x71   :  { %392 = vmatpush3.bf16.xpose.msra.mxu0 %v436_v10 }
  0x78   :  { %394 = vmatmul.mubr.bf16.vlgmr.msra.gmra.mrb[0].mxu0 %v70_v11 }
 0x14b   :  { %v171_v15 = vpop.f32.mrb[0].mxu0 }
 0x14c   :  { %v172_v16 = vadd.f32 %v171_v15, %v88_v14  ;;  %v395_v17 = vpop.f32.mrb[1].mxu0 }
 0x14d   :  { %v174_v18 = vpop.f32.mrb[2].mxu0 }
 0x14e   :  { %178 = vmax.xlane.f32.xlu0 %v172_v16  ;;  %v396_v19 = vpop.f32.mrb[3].mxu0 }
 0x1db   :  { %v179_v26 = vpop.xlane.xlu0 %178 }
 0x1dc   :  { %v180_v27 = vmax.f32 %v177_v25, %v179_v26 }
 0x1de   :  { %v181_v28 = vsub.f32 %v177_v25, %v180_v27  ;;  %313 = vst.msk [vmem:[#allocation3] sm:$0xff] %vm66_vm1, %v180_v27  ;;  %186 = vperm.xlu0 %427, %v180_v27  }
 0x1e0   :  { %v182_v38 = vmul.f32 1.442695, %v181_v28 }
 0x25d   :  { %v187_v33 = vpop.permute.xlu0 %186 }
 0x25e   :  { %v189_v34 = vsub.f32 %v172_v16, %v187_v33 }
 0x260   :  { %v190_v35 = vmul.f32 1.442695, %v189_v34 }
 0x262   :  { %445 = vpow2.f32 %v190_v35 }
 0x263   :  { %447 = vpow2.f32 %v182_v38 }
 0x26c   :  { %v446_v36 = vpop.eup %445 }
 0x26d   :  { %194 = vadd.xlane.f32.xlu1 %v446_v36  ;;  %v206_v37 = vpack.c.bf16 %v446_v36, %v446_v36  ;;  %v448_v39 = vpop.eup %447 }
 0x26e   :  { %v193_v41 = vmul.f32 %v448_v39, %v192_v40 }
 0x26f   :  { %414 = vmatmul.mubr.bf16.vlgmr.msra.gmra.mrb[0].mxu1 %v206_v37 }
 0x27e   :  { %202 = vperm.xlu1 %428, %v448_v39  }
 0x2fa   :  { %v195_v42 = vpop.xlane.xlu1 %194 }
 0x2fb   :  { %v196_v43 = vadd.f32 %v195_v42, %v193_v41 }
 0x2fd   :  { %198 = vst.msk [vmem:[#allocation4] sm:$0xff] %vm66_vm1, %v196_v43 }
 0x2fe   :  { %v203_v50 = vpop.permute.xlu1 %202 }
 0x2ff   :  { %v205_v51 = vmul.f32 0.0, %v203_v50 }
 0x304   :  { %v317_v44 = vld [vmem:[#allocation4] sm:$0xff] }
 0x305   :  { %449 = vrcp.f32 %v317_v44 }
 0x30f   :  { %v450_v45 = vpop.eup %449 }
 0x310   :  { %322 = vperm.xlu1 %428, %v450_v45  }
 0x342   :  { %v305_v46 = vpop.f32.mrb[0].mxu1 }
 0x343   :  { %v415_v47 = vpop.f32.mrb[1].mxu1  ;;  %v311_v52 = vadd.f32 %v305_v46, %v205_v51 }
 0x344   :  { %v308_v48 = vpop.f32.mrb[2].mxu1 }
 0x345   :  { %v416_v49 = vpop.f32.mrb[3].mxu1 }
 0x38f   :  { %v323_v53 = vpop.permute.xlu1 %322 }
 0x390   :  { %v325_v54 = vmul.f32 %v323_v53, %v311_v52 }
 0x392   :  { %326 = vst [vmem:[#allocation12] sm:$0xff] %v325_v54 }
 0x393   :  { %528 = shalt.err (!%p525_p0)
}
 0x394   :  { %s529_s30 = scalar_lea.hbm %s664_s4, 128 }
 0x395   :  { %p530_p1 = scmp.ne.s32.totalorder %s664_s4, %s529_s30  ;;  %p533_p2 = scmp.lt.u32.totalorder %s529_s30, %s664_s4 }
 0x397   :  { %p535_p3 = pnand %p533_p2, %p530_p1 }
 0x399   :  { %538 = shalt.err (!%p535_p3)
}
 0x39a   :  { %336 = dma.vmem_to_hbm [thread:$0]  %s334_s26, 128, %s664_s4, [#allocation8]  }
 0x39b   :  { %543 = dma.done.wait [#allocation8], 128  }
 0x39c   :  { %544 = vsyncadd [#allocation8], 4294967168 }
 0x39d   :  { %340 = vsyncpa [#allocation7], 1 }
 0x39e   :  { %341 = vsyncpa [#allocation10], 1 }
 0x39f   :  { %342 = vsyncpa [#allocation8], 1 }

</bundles_post_ra>
